<compile_context>
chip_gen: v6e
topology: v6e:2x2x1
jax: 0.10.0
libtpu: 0.0.40
codegen_flags: <defaults>
</compile_context>

<pallas_src>
import functools

import jax
import jax.numpy as jnp
from jax import lax
from jax.experimental import pallas as pl
from jax.experimental.pallas import tpu as pltpu

_LANE = 128          # lane width
_ROW_SUB = 128       # rows per in-kernel sub-tile (f32: (128,128) chunk = 16 vregs)
_SMALL_C_MAX = 8     # up to this many classes use the VPU lane-dense path


def _round_up(x, m):
    return (x + m - 1) // m * m


def _attn_net_kernel_small_c(x_ref, w_ref, b_ref, a_ref, *, activate, L, C):
    """VPU path for 1 <= C <= 8 classes.

    x_ref: (TN, L)  VMEM, streamed row tile
    w_ref: (C, L)   VMEM, resident (torch Linear weight layout)
    b_ref: (C,)     SMEM, resident scalar biases
    a_ref: (C, TN)  VMEM, lane-dense output block
    """
    tn = x_ref.shape[0]
    n_sub = tn // _ROW_SUB
    n_full = L // _LANE
    rem = L - n_full * _LANE

    def row_tile(s, carry):
        r = pl.multiple_of(s * _ROW_SUB, _ROW_SUB)
        outs = []
        for c in range(C):                                  # static, tiny (C <= 8)
            partials = []
            if n_full > 0:
                acc = jnp.zeros((_ROW_SUB, _LANE), jnp.float32)
                for lc in range(n_full):                    # static, L/128 chunks
                    lo = lc * _LANE
                    xc = x_ref[pl.ds(r, _ROW_SUB), lo:lo + _LANE]
                    wc = w_ref[c:c + 1, lo:lo + _LANE]
                    acc = acc + xc.astype(jnp.float32) * wc.astype(jnp.float32)
                partials.append(jnp.sum(acc, axis=-1))      # single lane reduce
            if rem > 0:                                     # ragged L tail (< 128 lanes)
                lo = n_full * _LANE
                xc = x_ref[pl.ds(r, _ROW_SUB), lo:L]
                wc = w_ref[c:c + 1, lo:L]
                partials.append(
                    jnp.sum(xc.astype(jnp.float32) * wc.astype(jnp.float32), axis=-1))
            a_c = partials[0]
            for p in partials[1:]:
                a_c = a_c + p
            a_c = a_c + b_ref[c]
            if activate:
                a_c = jnp.tanh(a_c)
            outs.append(a_c)
        block = jnp.stack(outs, axis=0)                     # (C, _ROW_SUB), lane-dense
        a_ref[:, pl.ds(r, _ROW_SUB)] = block.astype(a_ref.dtype)
        return carry

    lax.fori_loop(0, n_sub, row_tile, 0)


def _attn_net_kernel_mxu(x_ref, w_ref, b_ref, a_ref, *, activate):
    # General n_classes > 8 path: (TN, L) @ (L, C) on the MXU, bias broadcast on VPU.
    a = jnp.dot(x_ref[...], w_ref[...], preferred_element_type=jnp.float32)
    a = a + b_ref[...]                                      # (TN, C) + (1, C)
    if activate:
        a = jnp.tanh(a)
    a_ref[...] = a.astype(a_ref.dtype)


def my_attn_net_forward(x, w, b, *, activate=False, block_n=2048,
                        lane_dense_output=False):
    """Pallas implementation of My_Attn_Net.forward.

    Args:
      x: (N, L) input (N = bag size / number of instances), f32 or bf16.
      w: (L, C) weight (transpose of torch Linear's (C, L) weight).
      b: (C,)  bias.
      activate: apply Tanh after the linear layer (matches `activate=True`).
      block_n: target row-tile size (rounded/capped to fit VMEM and split the grid).
      lane_dense_output: if True and C <= 8, return A lane-dense as (C, N) and skip
        the wrapper-side relayout (useful if the consumer can take that layout).

    Returns:
      (A, x) mirroring the PyTorch module; A is (N, C) unless lane_dense_output.
    """
    N, L = x.shape
    C = w.shape[1]

    # TODO(synk): Dropout(0.3) (training-mode RNG) not implemented; default config has it off.
    # TODO(synk): biggest end-to-end win would be fusing the downstream CLAM softmax /
    #             A^T @ x pooling into this kernel so x is not re-read from HBM.

    itemsize = jnp.dtype(x.dtype).itemsize

    # Row tile: multiple of 128 (lane-dense output / sublane constraints), capped so
    # (a) the grid has >=4 steps when N allows it (v7x: both TCs get >=2 tiles) and
    # (b) the double-buffered x window stays ~<=22 MiB.
    tn = _round_up(max(1, min(block_n, N)), _ROW_SUB)
    tn = min(tn, _round_up(-(-N // 4), _ROW_SUB))
    max_rows = max(_ROW_SUB,
                   (22 * 1024 * 1024) // (2 * L * itemsize) // _ROW_SUB * _ROW_SUB)
    tn = max(_ROW_SUB, min(tn, max_rows))
    grid = (pl.cdiv(N, tn),)

    cost = pl.CostEstimate(
        flops=2 * N * L * C,
        transcendentals=(N * C) if activate else 0,
        bytes_accessed=N * L * itemsize + N * C * itemsize + L * C * 4 + C * 4,
    )
    compiler_params = pltpu.CompilerParams(
        dimension_semantics=("parallel",),        # shard row tiles across v7x's 2 TCs
        vmem_limit_bytes=32 * 1024 * 1024,        # we keep buffers well under this
    )

    if C <= _SMALL_C_MAX:
        kernel = functools.partial(_attn_net_kernel_small_c,
                                   activate=activate, L=L, C=C)
        a_cn = pl.pallas_call(
            kernel,
            out_shape=jax.ShapeDtypeStruct((C, N), x.dtype),
            grid_spec=pltpu.PrefetchScalarGridSpec(
                num_scalar_prefetch=0,
                grid=grid,
                in_specs=[
                    pl.BlockSpec((tn, L), lambda i: (i, 0)),             # streamed x tiles
                    pl.BlockSpec((C, L), lambda i: (0, 0)),              # resident weight
                    pl.BlockSpec(memory_space=pltpu.MemorySpace.SMEM),   # scalar biases
                ],
                out_specs=pl.BlockSpec((C, tn), lambda i: (0, i)),       # lane-dense output
            ),
            compiler_params=compiler_params,
            cost_estimate=cost,
        )(x, jnp.transpose(w), b.reshape(C))
        a = a_cn if lane_dense_output else jnp.transpose(a_cn)          # (N, C) default
    else:
        kernel = functools.partial(_attn_net_kernel_mxu, activate=activate)
        a = pl.pallas_call(
            kernel,
            out_shape=jax.ShapeDtypeStruct((N, C), x.dtype),
            grid_spec=pltpu.PrefetchScalarGridSpec(
                num_scalar_prefetch=0,
                grid=grid,
                in_specs=[
                    pl.BlockSpec((tn, L), lambda i: (i, 0)),   # streamed x tiles
                    pl.BlockSpec((L, C), lambda i: (0, 0)),    # resident weight
                    pl.BlockSpec((1, C), lambda i: (0, 0)),    # resident bias
                ],
                out_specs=pl.BlockSpec((tn, C), lambda i: (i, 0)),
            ),
            compiler_params=compiler_params,
            cost_estimate=cost,
        )(x, w, b.reshape(1, C))

    return a, x


if __name__ == "__main__":
    # Small shapes consistent with the module; N deliberately ragged (not a multiple of
    # the 128-row tile) to exercise the tiled grid + tail-block handling; L not a
    # multiple of 128 to exercise the ragged lane-chunk path.
    N, L, C = 200, 32, 1

    key = jax.random.PRNGKey(0)
    kx, kw, kb = jax.random.split(key, 3)

    x = jax.random.normal(kx, (N, L), dtype=jnp.float32)
    bound = 1.0 / jnp.sqrt(jnp.float32(L))
    w = jax.random.uniform(kw, (L, C), dtype=jnp.float32, minval=-bound, maxval=bound)
    b = jax.random.uniform(kb, (C,), dtype=jnp.float32, minval=-bound, maxval=bound)

    # Default config (n_classes=1, no activation): VPU / lane-dense fast path.
    a_out, x_out = my_attn_net_forward(x, w, b, activate=False)
    jax.block_until_ready((a_out, x_out))
    a_ref = x @ w + b.reshape(1, C)
    assert a_out.shape == (N, C)
    assert x_out.shape == (N, L)
    assert jnp.allclose(a_out, a_ref, atol=1e-5, rtol=1e-5)
    assert jnp.array_equal(x_out, x)

    # Small multi-class (n_classes=4, activate=True): still the VPU lane-dense path.
    C2 = 4
    w2 = jax.random.uniform(kw, (L, C2), dtype=jnp.float32, minval=-bound, maxval=bound)
    b2 = jax.random.uniform(kb, (C2,), dtype=jnp.float32, minval=-bound, maxval=bound)
    a2_out, _ = my_attn_net_forward(x, w2, b2, activate=True)
    jax.block_until_ready(a2_out)
    a2_ref = jnp.tanh(x @ w2 + b2.reshape(1, C2))
    assert a2_out.shape == (N, C2)
    assert jnp.allclose(a2_out, a2_ref, atol=1e-5, rtol=1e-5)

    # Larger class count (n_classes=16): MXU fallback path.
    C3 = 16
    w3 = jax.random.uniform(kw, (L, C3), dtype=jnp.float32, minval=-bound, maxval=bound)
    b3 = jax.random.uniform(kb, (C3,), dtype=jnp.float32, minval=-bound, maxval=bound)
    a3_out, _ = my_attn_net_forward(x, w3, b3, activate=True)
    jax.block_until_ready(a3_out)
    a3_ref = jnp.tanh(x @ w3 + b3.reshape(1, C3))
    assert a3_out.shape == (N, C3)
    assert jnp.allclose(a3_out, a3_ref, atol=1e-5, rtol=1e-5)

    print("KERNEL_OK")
</pallas_src>

<mosaic_0001>
module attributes {stable_mosaic.version = 11 : i64} {
  func.func @_attn_net_kernel_small_c(%arg0: i32, %arg1: memref<128x32xf32, #tpu.memory_space<vmem>>, %arg2: memref<1x32xf32, #tpu.memory_space<vmem>>, %arg3: memref<1xf32, #tpu.memory_space<smem>>, %arg4: memref<1x128xf32, #tpu.memory_space<vmem>>) attributes {dimension_semantics = [#tpu.dimension_semantics<parallel>], iteration_bounds = array<i64: 2>, scalar_prefetch = 0 : i64, scratch_operands = 0 : i64, tpu.core_type = #tpu.core_type<tc>, window_params = [{transform_indices = @transform_0, window_bounds = array<i64: 128, 32>}, {pipeline_mode = #tpu.pipeline_mode<synchronous>, transform_indices = @transform_1, window_bounds = array<i64: 1, 32>}, {transform_indices = @transform_2, window_bounds = array<i64: 1>}, {transform_indices = @transform_3, window_bounds = array<i64: 1, 128>}]} {
    %c0_i32 = arith.constant 0 : i32
    %c128_i32 = arith.constant 128 : i32
    %0 = arith.muli %c0_i32, %c128_i32 : i32
    %1 = tpu.assume_multiple %0, 128 : i32
    %2 = arith.index_cast %1 : i32 to index
    %c0 = arith.constant 0 : index
    %3 = vector.load %arg1[%2, %c0] : memref<128x32xf32, #tpu.memory_space<vmem>>, vector<128x32xf32>
    %c0_0 = arith.constant 0 : index
    %c0_1 = arith.constant 0 : index
    %4 = vector.load %arg2[%c0_0, %c0_1] : memref<1x32xf32, #tpu.memory_space<vmem>>, vector<1x32xf32>
    %5 = vector.broadcast %4 : vector<1x32xf32> to vector<128x32xf32>
    %6 = arith.mulf %3, %5 : vector<128x32xf32>
    %cst = arith.constant dense<0.000000e+00> : vector<128xf32>
    %7 = vector.multi_reduction <add>, %6, %cst [1] : vector<128x32xf32> to vector<128xf32>
    %c0_2 = arith.constant 0 : index
    %8 = memref.load %arg3[%c0_2] : memref<1xf32, #tpu.memory_space<smem>>
    %9 = vector.broadcast %8 : f32 to vector<128xf32>
    %10 = arith.addf %7, %9 : vector<128xf32>
    %11 = vector.shape_cast %10 : vector<128xf32> to vector<1x128xf32>
    %c0_3 = arith.constant 0 : index
    %12 = arith.index_cast %1 : i32 to index
    %13 = vector.load %arg4[%c0_3, %12] : memref<1x128xf32, #tpu.memory_space<vmem>>, vector<1x128xf32>
    tpu.vector_store %arg4[%c0_3, %12], %11 {strides = array<i32>} : memref<1x128xf32, #tpu.memory_space<vmem>>, vector<1x128xf32>,
    %c1_i32 = arith.constant 1 : i32
    return
  }
  func.func @transform_0(%arg0: i32) -> (i32, i32) {
    %c0_i32 = arith.constant 0 : i32
    %c0_i32_0 = arith.constant 0 : i32
    return %arg0, %c0_i32 : i32, i32
  }
  func.func @transform_1(%arg0: i32) -> (i32, i32) {
    %c0_i32 = arith.constant 0 : i32
    %c0_i32_0 = arith.constant 0 : i32
    %c0_i32_1 = arith.constant 0 : i32
    return %c0_i32, %c0_i32_0 : i32, i32
  }
  func.func @transform_2(%arg0: i32) -> i32 {
    %c0_i32 = arith.constant 0 : i32
    %c0_i32_0 = arith.constant 0 : i32
    return %c0_i32 : i32
  }
  func.func @transform_3(%arg0: i32) -> (i32, i32) {
    %c0_i32 = arith.constant 0 : i32
    %c0_i32_0 = arith.constant 0 : i32
    return %c0_i32, %arg0 : i32, i32
  }
}

</mosaic_0001>

<bundles_post_ra>
// kernel: tpu_custom_call.1
= control target key start
LH: loop header
LB: loop body
LE: loop exit
PB: predicated region body
PF: predicated region fallthrough
CT: control target
= control target key end

     0   :  { %s812_s0 = inlined_call_operand.vmem [shape: f32[200,32], index: 0, kind: input, shape index: {}]   ;;  %s813_s1 = inlined_call_operand.vmem [shape: f32[1,32], index: 1, kind: input, shape index: {}]   ;;  %s814_s2 = inlined_call_operand.<no memory space> [shape: f32[1], index: 2, kind: input, shape index: {}]   ;;  %s815_s3 = inlined_call_operand.hbm [shape: f32[1,200], index: 3, kind: output, shape index: {}]  }
   0x1   :  { %8 = sst [smem:[#allocation2]] %s814_s2 }
   0x2   :  { %9 = vsyncpa [#allocation4], 0 }
   0x3   :  { %11 = vsyncpa [#allocation4 + $0x1], 0  ;;  %s629_s14 = smov 0   ;;  %s631_s15 = smov 0  }
   0x4   :  { %s633_s16 = smov 0   ;;  %s635_s17 = smov 0  }
   0x5 LB: > { %s493_s2 = sadd.s32 4294967295, %s603_s17   ;;  %s494_s18 = sadd.s32 4294967294, %s603_s17   ;;  %s603_s17 = sphi %s635_s17, %s821_s17   ;;  %s599_s16 = sphi %s633_s16, %s820_s16   ;;  %s595_s15 = sphi %s631_s15, %s819_s15   ;;  %s591_s14 = sphi %s629_s14, %s818_s14  }
   0x6   : > { %s652_s19 = sadd.s32 1, %s603_s17   ;;  %s92_s20 = sadd.s32 1, %s599_s16 }
   0x7   : > { %s89_s21 = ssub.s32 %s603_s17, %s652_s19  ;;  %p102_p0 = scmp.ne.s32.totalorder %s599_s16, %s595_s15 }
   0x8   : > { %p90_p1 = scmp.eq.s32.totalorder %s89_s21, 0  ;;  %p103_p2 = scmp.eq.s32.totalorder %s493_s2, 1 }
   0x9   : > { %p108_p3 = scmp.ne.s32.totalorder %s595_s15, %s591_s14  ;;  %p109_p4 = scmp.eq.s32.totalorder %s494_s18, 1 }
   0xa   : > { %s662_s22 = scalar_select %p90_p1, %s599_s16, %s92_s20  }
   0xb   : > { %p664_p5 = por %p103_p2, %p102_p0  ;;  %p668_p6 = por %p109_p4, %p108_p3 }
   0xc   : > { %p497_p7 = scmp.ge.s32.totalorder %s603_s17, 1  ;;  %p150_p8 = scmp.lt.s32.totalorder %s603_s17, 3 }
   0xe   : > { %p151_p9 = pnand %p497_p7, %p150_p8 }
   0xf   : > { %s674_s25 = sshll.u32 (!%p151_p9), %s493_s2, 4  ;;  %s279_s6 = sld [smem:[#allocation2]] (!%p151_p9) }
  0x10   : > { %154 = sbr.rel (%p151_p9) target bundleno = 214 (0xd6), region = 32  ;;  %p182_p10 = scmp.lt.s32.totalorder (!%p151_p9), %s674_s25, 24 }
  0x11   : > { %s175_s7 = sand.u32 (!%p151_p9), 1, %s595_s15   ;;  %s777_s12 = scalar_lea.hbm (!%p151_p9), %s815_s3, %s674_s25 }
  0x12   : > { %s176_s8 = scalar_lea.vmem (!%p151_p9), [#allocation3], %s175_s7  ;;  %s427_s13 = scalar_lea.sflag (!%p151_p9), [#allocation4], %s175_s7 }
  0x13   : > { %s439_s9 = sshll.u32 (!%p151_p9), %s176_s8, 4  ;;  %s605_s18 = smov (!%p151_p9), [#allocation3]   ;;  %s440_s9 = int_to_ptr.vmem [resolvable:$true] %s439_s9 }
  0x14   : > { %s543_s2 = scalar_lea.vmem (!%p151_p9), %s440_s9, 16  ;;  %s547_s20 = sshll.u32 (!%p151_p9), %s605_s18, 4  ;;  %s548_s20 = int_to_ptr.vmem [resolvable:$false] %s547_s20 }
  0x15   : > { %s183_s26 = scalar_select %p182_p10, %s674_s25, 24  ;;  %v500_v0 = vld [vmem:[%s813_s1] ss:$0 sm:$0xff]  ;;  %vm230_vm0 = vcmask 261120   ;;  %v313_v49 = vlaneseq  ;;  %v724_v54 = vstv %s279_s6  ;;  %vm324_vm1 = vcmask 130112  }
  0x16   : > { %vm331_vm2 = vcmask 195712   ;;  %vm338_vm3 = vcmask 261312   ;;  %vm345_vm4 = vcmask 326912   ;;  %vm352_vm5 = vcmask 392512   ;;  %p544_p11 = scmp.ne.s32.totalorder %s440_s9, %s543_s2  ;;  %s549_s21 = scalar_lea.vmem %s548_s20, 32 }
  0x17   : > { %s499_s27 = sshll.u32 %s183_s26, 3  ;;  %v718_v50 = vand.u32 127, %v313_v49  ;;  %v720_v51 = vshrl.u32 %v313_v49, 7  ;;  %vm359_vm6 = vcmask 458112   ;;  %vm366_vm7 = vcmask 523712   ;;  %p550_p0 = scmp.lt.s32.totalorder %s440_s9, %s548_s20 }
  0x18   : > { %s684_s5 = scalar_lea.vmem %s812_s0, %s499_s27  ;;  %vm373_vm8 = vcmask 589312   ;;  %vm380_vm9 = vcmask 654912   ;;  %vm387_vm10 = vcmask 720512   ;;  %vm394_vm11 = vcmask 786112   ;;  %p545_p12 = pnand %p544_p11, %p664_p5 }
  0x19   : > { %v191_v1 = vld [vmem:[%s684_s5] sm:$0xff]  ;;  %v193_v2 = vld [vmem:[%s684_s5 + $0x10] sm:$0xff]  ;;  %v192_v3 = vld [vmem:[%s684_s5 + $0x8] sm:$0xff]  ;;  %v319_v52 = vadd.s32 4294967288, %v718_v50  ;;  %v333_v53 = vadd.s32 4294967272, %v718_v50  ;;  %v326_v56 = vadd.s32 4294967280, %v718_v50  ;;  %v317_v59 = vsub.s32 %v718_v50, %v720_v51  ;;  %p551_p1 = scmp.lt.s32.totalorder %s549_s21, %s543_s2 }
  0x1a   : > { %v214_v4 = vmul.f32 %v500_v0, %v191_v1  ;;  %v216_v5 = vmul.f32 %v500_v0, %v193_v2  ;;  %v215_v6 = vmul.f32 %v500_v0, %v192_v3  ;;  %v194_v7 = vld [vmem:[%s684_s5 + $0x18] sm:$0xff]  ;;  %v195_v9 = vld [vmem:[%s684_s5 + $0x20] sm:$0xff]  ;;  %v196_v10 = vld [vmem:[%s684_s5 + $0x28] sm:$0xff]  ;;  %v340_v58 = vadd.s32 4294967264, %v718_v50  ;;  %p546_p13 = pneg %p545_p12 }
  0x1b   : > { %v217_v8 = vmul.f32 %v500_v0, %v194_v7  ;;  %v218_v15 = vmul.f32 %v500_v0, %v195_v9  ;;  %v219_v16 = vmul.f32 %v500_v0, %v196_v10  ;;  %v197_v17 = vld [vmem:[%s684_s5 + $0x30] sm:$0xff]  ;;  %v198_v18 = vld [vmem:[%s684_s5 + $0x38] sm:$0xff]  ;;  %v199_v23 = vld [vmem:[%s684_s5 + $0x40] sm:$0xff]  ;;  %v322_v61 = vsub.s32 %v319_v52, %v720_v51  ;;  %p552_p2 = por %p551_p1, %p550_p0 }
  0x1c   : > { %v231_v11 = vsel %vm230_vm0, %v214_v4, 0.0  ;;  %v237_v12 = vsel %vm230_vm0, %v216_v5, 0.0  ;;  %v234_v13 = vsel %vm230_vm0, %v215_v6, 0.0  ;;  %v220_v21 = vmul.f32 %v500_v0, %v197_v17  ;;  %v200_v24 = vld [vmem:[%s684_s5 + $0x48] sm:$0xff]  ;;  %v201_v29 = vld [vmem:[%s684_s5 + $0x50] sm:$0xff]  ;;  %v202_v30 = vld [vmem:[%s684_s5 + $0x58] sm:$0xff] }
  0x1d   : > { %232 = vadd.xlane.f32.xlu0 %v231_v11  ;;  %238 = vadd.xlane.f32.xlu1 %v237_v12  ;;  %v240_v14 = vsel %vm230_vm0, %v217_v8, 0.0  ;;  %v243_v19 = vsel %vm230_vm0, %v218_v15, 0.0  ;;  %v246_v20 = vsel %vm230_vm0, %v219_v16, 0.0  ;;  %v221_v22 = vmul.f32 %v500_v0, %v198_v18  ;;  %v203_v35 = vld [vmem:[%s684_s5 + $0x60] sm:$0xff]  ;;  %v204_v36 = vld [vmem:[%s684_s5 + $0x68] sm:$0xff]  ;;  %v205_v41 = vld [vmem:[%s684_s5 + $0x70] sm:$0xff]  ;;  %p553_p3 = pnand %p552_p2, %p546_p13 }
  0x1e   : > { %v249_v25 = vsel %vm230_vm0, %v220_v21, 0.0  ;;  %v222_v27 = vmul.f32 %v500_v0, %v199_v23  ;;  %v223_v28 = vmul.f32 %v500_v0, %v200_v24  ;;  %v224_v33 = vmul.f32 %v500_v0, %v201_v29  ;;  %v206_v42 = vld [vmem:[%s684_s5 + $0x78] sm:$0xff] }
  0x1f   : > { %v252_v26 = vsel %vm230_vm0, %v221_v22, 0.0  ;;  %v225_v34 = vmul.f32 %v500_v0, %v202_v30  ;;  %v226_v39 = vmul.f32 %v500_v0, %v203_v35  ;;  %v227_v40 = vmul.f32 %v500_v0, %v204_v36 }
  0x20   : > { %v255_v31 = vsel %vm230_vm0, %v222_v27, 0.0  ;;  %v258_v32 = vsel %vm230_vm0, %v223_v28, 0.0  ;;  %v261_v37 = vsel %vm230_vm0, %v224_v33, 0.0  ;;  %v228_v45 = vmul.f32 %v500_v0, %v205_v41 }
  0x21   : > { %235 = vadd.xlane.f32.xlu0 %v234_v13  ;;  %241 = vadd.xlane.f32.xlu1 %v240_v14  ;;  %v264_v38 = vsel %vm230_vm0, %v225_v34, 0.0  ;;  %v267_v43 = vsel %vm230_vm0, %v226_v39, 0.0  ;;  %v270_v44 = vsel %vm230_vm0, %v227_v40, 0.0  ;;  %v229_v46 = vmul.f32 %v500_v0, %v206_v42 }
  0x22   : > { %v273_v47 = vsel %vm230_vm0, %v228_v45, 0.0  ;;  %v336_v62 = vsub.s32 %v333_v53, %v720_v51  ;;  %v329_v63 = vsub.s32 %v326_v56, %v720_v51  ;;  %v347_v3 = vadd.s32 4294967256, %v718_v50 }
  0x23   : > { %v276_v48 = vsel %vm230_vm0, %v229_v46, 0.0  ;;  %v343_v6 = vsub.s32 %v340_v58, %v720_v51  ;;  %v354_v10 = vadd.s32 4294967248, %v718_v50  ;;  %v361_v15 = vadd.s32 4294967240, %v718_v50 }
  0x24   : > { %v350_v13 = vsub.s32 %v347_v3, %v720_v51  ;;  %v368_v23 = vadd.s32 4294967232, %v718_v50  ;;  %v375_v28 = vadd.s32 4294967224, %v718_v50  ;;  %v382_v34 = vadd.s32 4294967216, %v718_v50 }
  0x25   : > { %244 = vadd.xlane.f32.xlu0 %v243_v19  ;;  %247 = vadd.xlane.f32.xlu1 %v246_v20  ;;  %v357_v22 = vsub.s32 %v354_v10, %v720_v51  ;;  %v389_v40 = vadd.s32 4294967208, %v718_v50  ;;  %v396_v46 = vadd.s32 4294967200, %v718_v50  ;;  %vm401_vm12 = vcmask 851712  }
  0x26   : > { %v371_v33 = vsub.s32 %v368_v23, %v720_v51  ;;  %v385_v45 = vsub.s32 %v382_v34, %v720_v51  ;;  %vm408_vm13 = vcmask 917312   ;;  %vm415_vm14 = vcmask 982912  }
  0x27   : > { %v392_v52 = vsub.s32 %v389_v40, %v720_v51  ;;  %vm422_vm15 = vcmask 1048512  }
  0x29   : > { %250 = vadd.xlane.f32.xlu0 %v249_v25  ;;  %253 = vadd.xlane.f32.xlu1 %v252_v26  ;;  %v364_v26 = vsub.s32 %v361_v15, %v720_v51 }
  0x2d   : > { %256 = vadd.xlane.f32.xlu0 %v255_v31  ;;  %259 = vadd.xlane.f32.xlu1 %v258_v32 }
  0x31   : > { %262 = vadd.xlane.f32.xlu0 %v261_v37  ;;  %265 = vadd.xlane.f32.xlu1 %v264_v38  ;;  %v378_v38 = vsub.s32 %v375_v28, %v720_v51 }
  0x35   : > { %268 = vadd.xlane.f32.xlu0 %v267_v43  ;;  %271 = vadd.xlane.f32.xlu1 %v270_v44 }
  0x39   : > { %274 = vadd.xlane.f32.xlu0 %v273_v47  ;;  %277 = vadd.xlane.f32.xlu1 %v276_v48 }
  0xa6   : > { %v233_v55 = vpop.xlane.xlu0 %232  ;;  %v239_v57 = vpop.xlane.xlu1 %238 }
  0xa7   : > { %v281_v60 = vadd.f32 %v724_v54, %v233_v55  ;;  %v283_v0 = vadd.f32 %v724_v54, %v239_v57  ;;  %v403_v55 = vadd.s32 4294967192, %v718_v50 }
  0xa9   : > { %v318_v7 = vrot.slane %v281_v60, %v317_v59  ;;  %v330_v11 = vrot.slane %v283_v0, %v329_v63  ;;  %v399_v60 = vsub.s32 %v396_v46, %v720_v51 }
  0xaa   : > { %v236_v1 = vpop.xlane.xlu0 %235  ;;  %v242_v2 = vpop.xlane.xlu1 %241 }
  0xab   : > { %v282_v4 = vadd.f32 %v724_v54, %v236_v1  ;;  %v284_v5 = vadd.f32 %v724_v54, %v242_v2  ;;  %v406_v2 = vsub.s32 %v403_v55, %v720_v51 }
  0xad   : > { %v323_v8 = vrot.slane %v282_v4, %v322_v61  ;;  %v337_v9 = vrot.slane %v284_v5, %v336_v62  ;;  %v410_v61 = vadd.s32 4294967184, %v718_v50  ;;  %v417_v62 = vadd.s32 4294967176, %v718_v50 }
  0xae   : > { %v245_v12 = vpop.xlane.xlu0 %244  ;;  %v248_v14 = vpop.xlane.xlu1 %247 }
  0xaf   : > { %v325_v16 = vsel %vm324_vm1, %v323_v8, %v318_v7  ;;  %v285_v17 = vadd.f32 %v724_v54, %v245_v12  ;;  %v286_v18 = vadd.f32 %v724_v54, %v248_v14  ;;  %v413_v8 = vsub.s32 %v410_v61, %v720_v51 }
  0xb0   : > { %v332_v19 = vsel %vm331_vm2, %v330_v11, %v325_v16 }
  0xb1   : > { %v339_v20 = vsel %vm338_vm3, %v337_v9, %v332_v19  ;;  %v344_v21 = vrot.slane %v285_v17, %v343_v6  ;;  %v351_v24 = vrot.slane %v286_v18, %v350_v13  ;;  %v420_v9 = vsub.s32 %v417_v62, %v720_v51 }
  0xb2   : > { %v251_v25 = vpop.xlane.xlu0 %250  ;;  %v254_v27 = vpop.xlane.xlu1 %253 }
  0xb3   : > { %v346_v29 = vsel %vm345_vm4, %v344_v21, %v339_v20  ;;  %v287_v30 = vadd.f32 %v724_v54, %v251_v25  ;;  %v288_v31 = vadd.f32 %v724_v54, %v254_v27 }
  0xb4   : > { %v353_v35 = vsel %vm352_vm5, %v351_v24, %v346_v29 }
  0xb5   : > { %v358_v32 = vrot.slane %v287_v30, %v357_v22  ;;  %v365_v36 = vrot.slane %v288_v31, %v364_v26 }
  0xb6   : > { %v257_v37 = vpop.xlane.xlu0 %256  ;;  %v260_v39 = vpop.xlane.xlu1 %259 }
  0xb7   : > { %v360_v41 = vsel %vm359_vm6, %v358_v32, %v353_v35  ;;  %v289_v42 = vadd.f32 %v724_v54, %v257_v37  ;;  %v290_v43 = vadd.f32 %v724_v54, %v260_v39 }
  0xb8   : > { %v367_v47 = vsel %vm366_vm7, %v365_v36, %v360_v41 }
  0xb9   : > { %v372_v44 = vrot.slane %v289_v42, %v371_v33  ;;  %v379_v48 = vrot.slane %v290_v43, %v378_v38 }
  0xba   : > { %v263_v49 = vpop.xlane.xlu0 %262  ;;  %v266_v53 = vpop.xlane.xlu1 %265 }
  0xbb   : > { %v374_v56 = vsel %vm373_vm8, %v372_v44, %v367_v47  ;;  %v291_v57 = vadd.f32 %v724_v54, %v263_v49  ;;  %v292_v58 = vadd.f32 %v724_v54, %v266_v53 }
  0xbc   : > { %v381_v63 = vsel %vm380_vm9, %v379_v48, %v374_v56 }
  0xbd   : > { %v386_v59 = vrot.slane %v291_v57, %v385_v45  ;;  %v393_v0 = vrot.slane %v292_v58, %v392_v52 }
  0xbe   : > { %v269_v1 = vpop.xlane.xlu0 %268  ;;  %v272_v3 = vpop.xlane.xlu1 %271 }
  0xbf   : > { %v388_v4 = vsel %vm387_vm10, %v386_v59, %v381_v63  ;;  %v293_v5 = vadd.f32 %v724_v54, %v269_v1  ;;  %v294_v6 = vadd.f32 %v724_v54, %v272_v3 }
  0xc0   : > { %v395_v50 = vsel %vm394_vm11, %v393_v0, %v388_v4 }
  0xc1   : > { %v400_v7 = vrot.slane %v293_v5, %v399_v60  ;;  %v407_v10 = vrot.slane %v294_v6, %v406_v2 }
  0xc2   : > { %v275_v11 = vpop.xlane.xlu0 %274  ;;  %v278_v12 = vpop.xlane.xlu1 %277 }
  0xc3   : > { %v402_v13 = vsel %vm401_vm12, %v400_v7, %v395_v50  ;;  %v295_v14 = vadd.f32 %v724_v54, %v275_v11  ;;  %v296_v15 = vadd.f32 %v724_v54, %v278_v12 }
  0xc4   : > { %v409_v18 = vsel %vm408_vm13, %v407_v10, %v402_v13 }
  0xc5   : > { %v414_v16 = vrot.slane %v295_v14, %v413_v8  ;;  %v421_v17 = vrot.slane %v296_v15, %v420_v9 }
  0xc7   : > { %v416_v51 = vsel %vm415_vm14, %v414_v16, %v409_v18 }
  0xc8   : > { %v423_v19 = vsel %vm422_vm15, %v421_v17, %v416_v51 }
  0xc9   : > { %425 = vst [vmem:[%s176_s8] sm:$0x1] %v423_v19 }
  0xca   : > { %556 = shalt.err (!%p553_p3)
}
  0xcb   : > { %s557_s25 = scalar_lea.hbm %s777_s12, 16  ;;  %s561_s28 = scalar_lea.hbm %s815_s3, 32 }
  0xcc   : > { %p558_p4 = scmp.ne.s32.totalorder %s777_s12, %s557_s25  ;;  %p562_p9 = scmp.lt.s32.totalorder %s777_s12, %s815_s3 }
  0xcd   : > { %p563_p10 = scmp.lt.s32.totalorder %s561_s28, %s557_s25 }
  0xce   : > { %p559_p7 = pnand %p558_p4, %p664_p5 }
  0xcf   : > { %p564_p11 = por %p563_p10, %p562_p9 }
  0xd0   : > { %p560_p8 = pneg %p559_p7 }
  0xd2   : > { %p565_p12 = pnand %p564_p11, %p560_p8 }
  0xd4   : > { %568 = shalt.err (!%p565_p12)
}
  0xd5   : > { %504 = dma.vmem_to_hbm [thread:$0]  (%p664_p5), %s440_s9, 16, %s777_s12, %s427_s13  }
  0xd6 PF: > { %p510_p13 = scmp.ge.s32.totalorder %s603_s17, 2  ;;  %s451_s4 = sand.u32 1, %s591_s14  }
  0xd7   : > { %s452_s5 = scalar_lea.sflag [#allocation4], %s451_s4 }
  0xd8   : > { %p507_p0 = pnand %p510_p13, %p668_p6 }
  0xda   : > { %p508_p1 = pneg %p507_p0 }
  0xdc   : > { %586 = dma.done.wait (%p508_p1), %s452_s5, 16  }
  0xdd   : > { %588 = vsyncadd (%p508_p1), %s452_s5, 4294967280  ;;  %p14_p2 = scmp.ge.s32.totalorder %s652_s19, 4   ;;  %s818_s14 = smov %s595_s15 }
  0xde   : > { %s819_s15 = smov %s599_s16  ;;  %s820_s16 = smov %s662_s22 }
  0xdf   : > { %s821_s17 = smov %s652_s19  ;;  %16 = sbr.rel (!%p14_p2) target bundleno = 5 (0x5), region = 67 }
  0xe4   :  { %456 = vsyncpa [#allocation4], 1 }
  0xe5   :  { %458 = vsyncpa [#allocation4 + $0x1], 1 }

</bundles_post_ra>
